<compile_context>
chip_gen: v7x
topology: tpu7x:2x2x1
jax: 0.10.0
libtpu: 0.0.40
codegen_flags: <defaults>
</compile_context>

<pallas_src>
import numpy as np
import jax
import jax.numpy as jnp
from jax import lax
from jax.experimental import pallas as pl
from jax.experimental.pallas import tpu as pltpu

# ----------------------------- model config ---------------------------------
DENSE_NUM = 13                      # forward slices x[:, :13]
SPARSE_NUM = 5
EMB_DIM = 4
VOCAB = 10                          # synthetic vocab for the (undefined) embedding_dict
FEATURE_NUM = DENSE_NUM + SPARSE_NUM * EMB_DIM      # 33
FIELD_NUM = DENSE_NUM + SPARSE_NUM                  # 18
EXT_DIM = DENSE_NUM + SPARSE_NUM * VOCAB + 1        # 64: dense | one-hots | constant 1
LANE = 128                          # lane width of the lane-dense output / padded C
BATCH = 8


def feature_to_field(n: int) -> int:
    f = n if n < 14 else (n - 14) // EMB_DIM + 14
    # TODO(synk): the reference mapping yields field index == FIELD_NUM (out of range of
    # field_matrix) for the last EMB_DIM features; clamp to stay in-bounds (kernel and
    # numpy reference use the same clamped mapping, so they stay self-consistent).
    return min(f, FIELD_NUM - 1)


# ------------------------------- kernel --------------------------------------
def ffm_kernel(x_ref, c_ref, out_ref):
    # x_ref   : (B, 18)   f32  raw input row (13 dense values | 5 sparse ids as f32)
    # c_ref   : (64, 128) f32  fused parameter matrix (see precompute_combined_matrix)
    # out_ref : (B, 128)  f32  lane-dense output; cols [0, B) hold sigmoid(lin[r] + quad[c])
    B = x_ref.shape[0]
    x = x_ref[...]

    # ---- ext = [dense | onehot(sparse ids) | 1], built entirely in vregs ----
    dense = x[:, :DENSE_NUM]                                        # (B, 13)
    ids = x[:, DENSE_NUM:]                                          # (B, 5) f32 ids (0..9 exact)
    viota = lax.broadcasted_iota(jnp.int32, (B, VOCAB), 1).astype(jnp.float32)
    parts = [dense]
    for i in range(SPARSE_NUM):                                     # static, unrolled
        parts.append((ids[:, i:i + 1] == viota).astype(jnp.float32))
    parts.append(jnp.ones((B, 1), jnp.float32))
    ext = jnp.concatenate(parts, axis=-1)                           # (B, 64)

    # ---- one MXU pass: embedding lookup + pairwise coeffs + linear layer ----
    v = jnp.dot(ext, c_ref[...], preferred_element_type=jnp.float32)   # (B, 128)
    quad = jnp.sum(v[:, :EXT_DIM] * ext, axis=-1)                   # (B,)   a @ M @ a^T
    lin = v[:, EXT_DIM:EXT_DIM + 1]                                 # (B, 1) a @ w + bias

    # ---- reference broadcast quirk (B,1)+(B,) -> (B,B), lane-dense, in-register ----
    qrow = jnp.concatenate(
        [quad[None, :], jnp.zeros((1, LANE - B), jnp.float32)], axis=-1)   # (1, 128)
    z = lin + qrow                                                  # (B, 128); lanes >= B unused

    # ---- sigmoid on the EUP: exp + approximate reciprocal (stable form) -----
    e = jnp.exp(-jnp.abs(z))
    r = pl.reciprocal(1.0 + e, approx=True)
    out_ref[...] = jnp.where(z >= 0.0, r, e * r)


def ffm_pallas(x, c_mat):
    B = x.shape[0]
    out = pl.pallas_call(
        ffm_kernel,
        out_shape=jax.ShapeDtypeStruct((B, LANE), jnp.float32),
        in_specs=[
            pl.BlockSpec(memory_space=pltpu.MemorySpace.VMEM),
            pl.BlockSpec(memory_space=pltpu.MemorySpace.VMEM),
        ],
        out_specs=pl.BlockSpec(memory_space=pltpu.MemorySpace.VMEM),
    )(x, c_mat)
    # output.reshape(-1) as in the reference; lanes >= B are never consumed.
    # TODO(synk): the reference's .to(float64) has no TPU equivalent (no f64 hardware);
    # the cast is done host-side only for the correctness check.
    return out[:, :B].reshape(-1)


# ------------------------------- glue (host-side) ----------------------------
def build_params(key):
    keys = jax.random.split(key, 3 + SPARSE_NUM)
    k_fm, k_w, k_b = keys[0], keys[1], keys[2]
    field_matrix = jax.random.normal(k_fm, (FEATURE_NUM, FIELD_NUM, EMB_DIM), jnp.float32)
    lin_w = jax.random.normal(k_w, (1, FEATURE_NUM), jnp.float32) * 0.1
    lin_b = jax.random.normal(k_b, (1,), jnp.float32) * 0.1
    # TODO(synk): reference forward uses self.embedding_dict which is never defined in
    # __init__; synthesize one nn.Embedding(VOCAB, EMB_DIM) table per sparse feature.
    emb_tables = [jax.random.normal(keys[3 + i], (VOCAB, EMB_DIM), jnp.float32) * 0.5
                  for i in range(SPARSE_NUM)]
    return field_matrix, lin_w, lin_b, emb_tables


def precompute_combined_matrix(field_matrix, lin_w, lin_b, emb_tables):
    """Host-side (numpy f64) parameter folding into a tile-aligned C (64, 128).

    P (EXT_DIM x FEATURE_NUM) maps the one-hot-extended row to the features:
        ext @ P == [dense | emb_0 | ... | emb_4].
    Returns C with
        C[:, :EXT_DIM] = P @ M @ P^T   (M = strict-upper pairwise FFM coefficients)
        C[:,  EXT_DIM] = P @ w + bias * e_{EXT_DIM-1}  (ones column carries the bias)
        C[:,  EXT_DIM+1:] = 0          (lane padding to 128 for a tile-aligned DMA).
    """
    F = FEATURE_NUM
    fm = np.asarray(field_matrix, np.float64)
    field_of = np.array([feature_to_field(n) for n in range(F)])
    gathered = fm[:, field_of, :]                     # (F, F, E); gathered[i, j] = V[i, field(j)]
    m_full = np.einsum("ijd,jid->ij", gathered, gathered)
    ii = np.arange(F)[:, None]
    jj = np.arange(F)[None, :]
    M = np.where((ii >= 1) & (jj > ii), m_full, 0.0)  # (F, F), matches the reference double loop

    P = np.zeros((EXT_DIM, F), np.float64)
    for d in range(DENSE_NUM):
        P[d, d] = 1.0
    for i in range(SPARSE_NUM):
        tab = np.asarray(emb_tables[i], np.float64)   # (VOCAB, EMB_DIM)
        r0 = DENSE_NUM + i * VOCAB
        c0 = DENSE_NUM + i * EMB_DIM
        P[r0:r0 + VOCAB, c0:c0 + EMB_DIM] = tab

    m_ext = P @ M @ P.T                               # (EXT_DIM, EXT_DIM)
    w_ext = P @ np.asarray(lin_w, np.float64).reshape(F)
    w_ext[EXT_DIM - 1] += float(np.asarray(lin_b)[0])

    C = np.zeros((EXT_DIM, LANE), np.float64)
    C[:, :EXT_DIM] = m_ext
    C[:, EXT_DIM] = w_ext
    return jnp.asarray(C.astype(np.float32))          # (64, 128), tile-aligned


# pure numpy f64 reference (mirrors the PyTorch double loop) -------------------
def reference(x, field_matrix, lin_w, lin_b, emb_tables):
    xn = np.asarray(x, np.float64)
    fm = np.asarray(field_matrix, np.float64)
    w = np.asarray(lin_w, np.float64)
    b = np.asarray(lin_b, np.float64)
    dense = xn[:, :DENSE_NUM]
    sidx = xn[:, DENSE_NUM:].astype(np.int64)
    embs = [np.asarray(emb_tables[i], np.float64)[sidx[:, i]] for i in range(SPARSE_NUM)]
    a = np.concatenate([dense] + embs, axis=1)        # (B, FEATURE_NUM)
    B = a.shape[0]
    lin = a @ w.T + b                                 # (B, 1)
    res = np.zeros((B,), np.float64)
    for i in range(1, FEATURE_NUM):
        for j in range(i + 1, FEATURE_NUM):
            coef = np.dot(fm[i, feature_to_field(j)], fm[j, feature_to_field(i)])
            res = res + coef * a[:, i] * a[:, j]
    out = lin + res                                   # (B,1)+(B,) -> (B,B) (reference quirk)
    return (1.0 / (1.0 + np.exp(-out))).reshape(-1)


# ------------------------------- main -----------------------------------------
if __name__ == "__main__":
    key = jax.random.PRNGKey(0)
    k_params, k_dense, k_sparse = jax.random.split(key, 3)

    field_matrix, lin_w, lin_b, emb_tables = build_params(k_params)

    dense_vals = jax.random.normal(k_dense, (BATCH, DENSE_NUM), jnp.float32)
    sparse_vals = jax.random.randint(k_sparse, (BATCH, SPARSE_NUM), 0, VOCAB).astype(jnp.float32)
    x = jnp.concatenate([dense_vals, sparse_vals], axis=1)            # (B, 18)

    c_mat = precompute_combined_matrix(field_matrix, lin_w, lin_b, emb_tables)   # (64, 128)

    out = ffm_pallas(x, c_mat)                                        # (B*B,) f32
    out = jax.block_until_ready(out)

    ref = reference(x, field_matrix, lin_w, lin_b, emb_tables)
    # approx reciprocal trades ~1e-3 abs accuracy on the sigmoid for the free EUP slot
    np.testing.assert_allclose(np.asarray(out, np.float64), ref, rtol=5e-3, atol=5e-3)

    print("KERNEL_OK")
</pallas_src>

<mosaic_0001>
module attributes {stable_mosaic.version = 11 : i64} {
  func.func @ffm_kernel(%arg0: memref<8x18xf32, #tpu.memory_space<vmem>>, %arg1: memref<64x128xf32, #tpu.memory_space<vmem>>, %arg2: memref<8x128xf32, #tpu.memory_space<vmem>>) attributes {dimension_semantics = [], scalar_prefetch = 0 : i64, scratch_operands = 0 : i64, tpu.core_type = #tpu.core_type<tc>} {
    %c0 = arith.constant 0 : index
    %c0_0 = arith.constant 0 : index
    %0 = vector.load %arg0[%c0, %c0_0] : memref<8x18xf32, #tpu.memory_space<vmem>>, vector<8x18xf32>
    %1 = vector.extract_strided_slice %0 {offsets = [0, 0], sizes = [8, 13], strides = [1, 1]} : vector<8x18xf32> to vector<8x13xf32>
    %2 = vector.extract_strided_slice %0 {offsets = [0, 13], sizes = [8, 5], strides = [1, 1]} : vector<8x18xf32> to vector<8x5xf32>
    %3 = tpu.iota {dimensions = array<i32: 1>} : vector<8x10xi32>
    %4 = arith.sitofp %3 : vector<8x10xi32> to vector<8x10xf32>
    %5 = vector.extract_strided_slice %2 {offsets = [0, 0], sizes = [8, 1], strides = [1, 1]} : vector<8x5xf32> to vector<8x1xf32>
    %6 = vector.broadcast %5 : vector<8x1xf32> to vector<8x10xf32>
    %7 = arith.cmpf oeq, %6, %4 : vector<8x10xf32>
    %8 = arith.extui %7 : vector<8x10xi1> to vector<8x10xi32>
    %9 = arith.sitofp %8 : vector<8x10xi32> to vector<8x10xf32>
    %10 = vector.extract_strided_slice %2 {offsets = [0, 1], sizes = [8, 1], strides = [1, 1]} : vector<8x5xf32> to vector<8x1xf32>
    %11 = vector.broadcast %10 : vector<8x1xf32> to vector<8x10xf32>
    %12 = arith.cmpf oeq, %11, %4 : vector<8x10xf32>
    %13 = arith.extui %12 : vector<8x10xi1> to vector<8x10xi32>
    %14 = arith.sitofp %13 : vector<8x10xi32> to vector<8x10xf32>
    %15 = vector.extract_strided_slice %2 {offsets = [0, 2], sizes = [8, 1], strides = [1, 1]} : vector<8x5xf32> to vector<8x1xf32>
    %16 = vector.broadcast %15 : vector<8x1xf32> to vector<8x10xf32>
    %17 = arith.cmpf oeq, %16, %4 : vector<8x10xf32>
    %18 = arith.extui %17 : vector<8x10xi1> to vector<8x10xi32>
    %19 = arith.sitofp %18 : vector<8x10xi32> to vector<8x10xf32>
    %20 = vector.extract_strided_slice %2 {offsets = [0, 3], sizes = [8, 1], strides = [1, 1]} : vector<8x5xf32> to vector<8x1xf32>
    %21 = vector.broadcast %20 : vector<8x1xf32> to vector<8x10xf32>
    %22 = arith.cmpf oeq, %21, %4 : vector<8x10xf32>
    %23 = arith.extui %22 : vector<8x10xi1> to vector<8x10xi32>
    %24 = arith.sitofp %23 : vector<8x10xi32> to vector<8x10xf32>
    %25 = vector.extract_strided_slice %2 {offsets = [0, 4], sizes = [8, 1], strides = [1, 1]} : vector<8x5xf32> to vector<8x1xf32>
    %26 = vector.broadcast %25 : vector<8x1xf32> to vector<8x10xf32>
    %27 = arith.cmpf oeq, %26, %4 : vector<8x10xf32>
    %28 = arith.extui %27 : vector<8x10xi1> to vector<8x10xi32>
    %29 = arith.sitofp %28 : vector<8x10xi32> to vector<8x10xf32>
    %cst = arith.constant 1.000000e+00 : f32
    %30 = vector.broadcast %cst : f32 to vector<8x1xf32>
    %31 = tpu.concatenate %1, %9, %14, %19, %24, %29, %30 in 1 : vector<8x13xf32>, vector<8x10xf32>, vector<8x10xf32>, vector<8x10xf32>, vector<8x10xf32>, vector<8x10xf32>, vector<8x1xf32> -> vector<8x64xf32>
    %c0_1 = arith.constant 0 : index
    %c0_2 = arith.constant 0 : index
    %32 = vector.load %arg1[%c0_1, %c0_2] : memref<64x128xf32, #tpu.memory_space<vmem>>, vector<64x128xf32>
    %cst_3 = arith.constant dense<0.000000e+00> : vector<8x128xf32>
    %33 = tpu.matmul %31, %32, %cst_3 {dimension_numbers = #tpu.dot_dimension_numbers<[1], [0], [0], [1], [0, 0, 1, 1], [], []>} : vector<8x64xf32>, vector<64x128xf32>, vector<8x128xf32> -> vector<8x128xf32>
    %34 = vector.extract_strided_slice %33 {offsets = [0, 0], sizes = [8, 64], strides = [1, 1]} : vector<8x128xf32> to vector<8x64xf32>
    %35 = arith.mulf %34, %31 : vector<8x64xf32>
    %cst_4 = arith.constant dense<0.000000e+00> : vector<8xf32>
    %36 = vector.multi_reduction <add>, %35, %cst_4 [1] : vector<8x64xf32> to vector<8xf32>
    %37 = vector.extract_strided_slice %33 {offsets = [0, 64], sizes = [8, 1], strides = [1, 1]} : vector<8x128xf32> to vector<8x1xf32>
    %38 = vector.shape_cast %36 : vector<8xf32> to vector<1x8xf32>
    %cst_5 = arith.constant 0.000000e+00 : f32
    %39 = vector.broadcast %cst_5 : f32 to vector<1x120xf32>
    %40 = tpu.concatenate %38, %39 in 1 : vector<1x8xf32>, vector<1x120xf32> -> vector<1x128xf32>
    %41 = vector.broadcast %37 : vector<8x1xf32> to vector<8x128xf32>
    %42 = vector.broadcast %40 : vector<1x128xf32> to vector<8x128xf32>
    %43 = arith.addf %41, %42 : vector<8x128xf32>
    %44 = math.absf %43 : vector<8x128xf32>
    %cst_6 = arith.constant 0.000000e+00 : f32
    %45 = vector.broadcast %cst_6 : f32 to vector<8x128xf32>
    %46 = arith.subf %45, %44 : vector<8x128xf32>
    %47 = math.exp %46 : vector<8x128xf32>
    %cst_7 = arith.constant 1.000000e+00 : f32
    %48 = vector.broadcast %cst_7 : f32 to vector<8x128xf32>
    %49 = arith.addf %48, %47 : vector<8x128xf32>
    %50 = tpu.reciprocal %49 {approx = true} : vector<8x128xf32> -> vector<8x128xf32>
    %cst_8 = arith.constant 0.000000e+00 : f32
    %51 = vector.broadcast %cst_8 : f32 to vector<8x128xf32>
    %52 = arith.cmpf oge, %43, %51 : vector<8x128xf32>
    %53 = arith.mulf %47, %50 : vector<8x128xf32>
    %54 = arith.select %52, %50, %53 : vector<8x128xi1>, vector<8x128xf32>
    %c0_9 = arith.constant 0 : index
    %c0_10 = arith.constant 0 : index
    %55 = vector.load %arg2[%c0_9, %c0_10] : memref<8x128xf32, #tpu.memory_space<vmem>>, vector<8x128xf32>
    tpu.vector_store %arg2[%c0_9, %c0_10], %54 {strides = array<i32>} : memref<8x128xf32, #tpu.memory_space<vmem>>, vector<8x128xf32>,
    return
  }
}

</mosaic_0001>

<bundles_post_ra>
// kernel: tpu_custom_call.1
= control target key start
LH: loop header
LB: loop body
LE: loop exit
PB: predicated region body
PF: predicated region fallthrough
CT: control target
= control target key end

     0   :  { %7 = vsyncpa [#allocation3], 0  ;;  %s478_s0 = inlined_call_operand.hbm [shape: f32[8,18], index: 0, kind: input, shape index: {}]   ;;  %s479_s1 = inlined_call_operand.hbm [shape: f32[64,128], index: 1, kind: input, shape index: {}]   ;;  %s480_s2 = inlined_call_operand.hbm [shape: f32[8,128], index: 2, kind: output, shape index: {}]  }
   0x1   :  { %8 = vsyncpa [#allocation6], 0 }
   0x2   :  { %9 = vsyncpa [#allocation4], 0  ;;  %s387_s9 = smov [#allocation2]   ;;  %s388_s11 = smov [#allocation5]  }
   0x3   :  { %s16_s10 = sshll.u32 %s387_s9, 4  ;;  %s25_s12 = sshll.u32 %s388_s11, 4  ;;  %s17_s10 = int_to_ptr.vmem [resolvable:$true] %s16_s10  ;;  %s421_s12 = int_to_ptr.vmem [resolvable:$true] %s25_s12 }
   0x4   :  { %s315_s15 = scalar_lea.hbm %s478_s0, 128 }
   0x5   :  { %p316_p0 = scmp.ne.s32.totalorder %s478_s0, %s315_s15  ;;  %p319_p1 = scmp.lt.u32.totalorder %s315_s15, %s478_s0 }
   0x7   :  { %p321_p2 = pnand %p319_p1, %p316_p0 }
   0x9   :  { %324 = shalt.err (!%p321_p2)
}
   0xa   :  { %s325_s20 = scalar_lea.vmem %s17_s10, 128  ;;  %p330_p4 = scmp.lt.s32.totalorder %s17_s10, %s17_s10 }
   0xb   :  { %p326_p3 = scmp.ne.s32.totalorder %s17_s10, %s325_s20  ;;  %p331_p5 = scmp.lt.s32.totalorder %s325_s20, %s325_s20 }
   0xd   :  { %p332_p6 = por %p331_p5, %p330_p4 }
   0xf   :  { %p333_p7 = pnand %p332_p6, %p326_p3 }
  0x11   :  { %336 = shalt.err (!%p333_p7)
}
  0x12   :  { %19 = dma.hbm_to_vmem [thread:$0]  %s478_s0, 128, %s17_s10, [#allocation3]  }
  0x13   :  { %s337_s25 = scalar_lea.hbm %s479_s1, 1024 }
  0x14   :  { %p338_p8 = scmp.ne.s32.totalorder %s479_s1, %s337_s25  ;;  %p341_p9 = scmp.lt.u32.totalorder %s337_s25, %s479_s1 }
  0x16   :  { %p343_p10 = pnand %p341_p9, %p338_p8 }
  0x18   :  { %346 = shalt.err (!%p343_p10)
}
  0x19   :  { %s347_s30 = scalar_lea.vmem %s421_s12, 1024  ;;  %p352_p12 = scmp.lt.s32.totalorder %s421_s12, %s421_s12 }
  0x1a   :  { %p348_p11 = scmp.ne.s32.totalorder %s421_s12, %s347_s30  ;;  %p353_p13 = scmp.lt.s32.totalorder %s347_s30, %s347_s30 }
  0x1c   :  { %p354_p0 = por %p353_p13, %p352_p12 }
  0x1e   :  { %p355_p1 = pnand %p354_p0, %p348_p11 }
  0x20   :  { %358 = shalt.err (!%p355_p1)
}
  0x21   :  { %s389_s0 = smov 128   ;;  %s390_s3 = smov 8  }
  0x22   :  { %31 = dma.hbm_to_vmem [thread:$0]  %s479_s1, 1024, %s421_s12, [#allocation6], %s389_s0, %s389_s0, %s390_s3  }
  0x23   :  { %381 = dma.done.wait [#allocation3], 128  }
  0x24   :  { %382 = vsyncadd [#allocation3], 4294967168 }
  0x25   :  { %383 = dma.done.wait [#allocation6], 1024  }
  0x26   :  { %384 = vsyncadd [#allocation6], 4294966272  ;;  %v391_v0 = vmov 15   ;;  %v392_v1 = vmov 13   ;;  %v452_v2 = vld [vmem:[#allocation2] sm:$0xff]  ;;  %v393_v3 = vmov 16   ;;  %v39_v12 = vlaneseq }
  0x27   :  { %307 = vset.pattern.permute.xlu1 %v391_v0  ;;  %305 = vset.pattern.permute.xlu0 %v392_v1  ;;  %v394_v4 = vmov 14   ;;  %v395_v5 = vmov 17   ;;  %v110_v6 = vld [vmem:[#allocation5] sm:$0xff]  ;;  %v111_v7 = vld [vmem:[#allocation5 + $0x8] sm:$0xff]  ;;  %v396_v8 = vmov 0.0|0.0   ;;  %v112_v10 = vld [vmem:[#allocation5 + $0x10] sm:$0xff] }
  0x28   :  { %58 = vperm.xlu1 %307, %v452_v2   ;;  %44 = vperm.xlu0 %305, %v452_v2   ;;  %v275_v9 = vpack.c.bf16 %v111_v7, %v110_v6  ;;  %v113_v11 = vld [vmem:[#allocation5 + $0x18] sm:$0xff]  ;;  %v114_v14 = vld [vmem:[#allocation5 + $0x20] sm:$0xff]  ;;  %v115_v15 = vld [vmem:[#allocation5 + $0x28] sm:$0xff]  ;;  %v460_v16 = vand.u32 127, %v39_v12  ;;  %vm397_vm1 = vmmov 0   ;;  %v398_v24 = vmov 0.0  }
  0x29   :  { %274 = vmatprep.subr.bf16.mxu0 %v396_v8  ;;  %v278_v13 = vpack.c.bf16 %v113_v11, %v112_v10  ;;  %v281_v17 = vpack.c.bf16 %v115_v15, %v114_v14  ;;  %v116_v18 = vld [vmem:[#allocation5 + $0x30] sm:$0xff]  ;;  %v117_v19 = vld [vmem:[#allocation5 + $0x38] sm:$0xff]  ;;  %271 = vmatprep.mubr.msk.f32.mxu0 %vm397_vm1, %v398_v24  ;;  %s399_s1 = smov 13   ;;  %v400_v26 = vmov 64   ;;  %s401_s6 = smov 33   ;;  %vm98_vm6 = vcmask 105472  }
  0x2a   :  { %276 = vmatpush3.bf16.msra.mxu0 %v275_v9  ;;  %v41_v20 = vcvt.s32.f32 %v460_v16  ;;  %v284_v21 = vpack.c.bf16 %v117_v19, %v116_v18  ;;  %s402_s7 = smov 23   ;;  %s403_s8 = smov 43   ;;  %vm100_vm7 = vcmask 187392   ;;  %vm102_vm8 = vcmask 269312  }
  0x2b   :  { %277 = vmatprep.subr.bf16.mxu0 %v396_v8  ;;  %s404_s9 = smov 53   ;;  %vm104_vm9 = vcmask 351232   ;;  %vm106_vm10 = vcmask 433152   ;;  %vm108_vm11 = vcmask 515072   ;;  %vm118_vm12 = vcmask 523264   ;;  %s405_s10 = smov [#allocation7]  }
  0x2c   :  { %308 = vset.pattern.permute.xlu1 %v393_v3  ;;  %306 = vset.pattern.permute.xlu0 %v394_v4  ;;  %v198_v49 = vshrl.u32 %v39_v12, 7  ;;  %vm202_vm13 = vcmask 64512   ;;  %s230_s11 = sshll.u32 %s405_s10, 4  ;;  %s231_s11 = int_to_ptr.vmem [resolvable:$true] %s230_s11 }
  0x2d   :  { %65 = vperm.xlu1 %308, %v452_v2   ;;  %51 = vperm.xlu0 %306, %v452_v2   ;;  %s359_s12 = scalar_lea.vmem %s231_s11, 128  ;;  %p364_p3 = scmp.lt.s32.totalorder %s231_s11, %s231_s11 }
  0x2e   :  { %279 = vmatpush3.bf16.msra.mxu0 %v278_v13  ;;  %v199_v50 = vsub.s32 %v460_v16, %v198_v49  ;;  %v211_v51 = vsub.s32 0, %v198_v49  ;;  %p360_p2 = scmp.ne.s32.totalorder %s231_s11, %s359_s12  ;;  %p365_p4 = scmp.lt.s32.totalorder %s359_s12, %s359_s12 }
  0x2f   :  { %280 = vmatprep.subr.bf16.mxu0 %v396_v8 }
  0x30   :  { %p366_p5 = por %p365_p4, %p364_p3 }
  0x31   :  { %309 = vset.pattern.permute.xlu1 %v395_v5  ;;  %310 = vset.pattern.permute.xlu0 %v400_v26 }
  0x32   :  { %72 = vperm.xlu1 %309, %v452_v2   ;;  %282 = vmatpush3.bf16.msra.mxu0 %v281_v17  ;;  %p367_p6 = pnand %p366_p5, %p360_p2 }
  0x33   :  { %283 = vmatprep.subr.bf16.mxu0 %v396_v8 }
  0x36   :  { %285 = vmatpush3.bf16.msra.mxu0 %v284_v21 }
  0xa7   :  { %v59_v22 = vpop.permute.xlu1 %58  ;;  %v45_v23 = vpop.permute.xlu0 %44 }
  0xa8   :  { %vm47_vm0 = vcmp.eq.f32.partialorder %v45_v23, %v41_v20  ;;  %vm61_vm2 = vcmp.eq.f32.partialorder %v59_v22, %v41_v20 }
  0xa9   :  { %v240_v25 = vsel %vm47_vm0, 1.0, %v398_v24  ;;  %v242_v29 = vsel %vm61_vm2, 1.0, %v398_v24 }
  0xaa   :  { %79 = vrot.lane.b32.xlu0 %v240_v25, %s399_s1 }
  0xac   :  { %v66_v27 = vpop.permute.xlu1 %65  ;;  %v52_v28 = vpop.permute.xlu0 %51 }
  0xad   :  { %vm54_vm3 = vcmp.eq.f32.partialorder %v52_v28, %v41_v20  ;;  %vm68_vm4 = vcmp.eq.f32.partialorder %v66_v27, %v41_v20 }
  0xae   :  { %v241_v30 = vsel %vm54_vm3, 1.0, %v398_v24  ;;  %87 = vrot.lane.b32.xlu0 %v242_v29, %s401_s6  ;;  %v243_v32 = vsel %vm68_vm4, 1.0, %v398_v24 }
  0xaf   :  { %83 = vrot.lane.b32.xlu1 %v241_v30, %s402_s7 }
  0xb1   :  { %v73_v31 = vpop.permute.xlu1 %72 }
  0xb2   :  { %vm75_vm5 = vcmp.eq.f32.partialorder %v73_v31, %v41_v20 }
  0xb3   :  { %v244_v33 = vsel %vm75_vm5, 1.0, %v398_v24  ;;  %91 = vrot.lane.b32.xlu1 %v243_v32, %s403_s8 }
  0xb4   :  { %95 = vrot.lane.b32.xlu0 %v244_v33, %s404_s9 }
 0x11c   :  { %v80_v34 = vpop.permute.xlu0 %79 }
 0x11d   :  { %v99_v35 = vsel %vm98_vm6, %v452_v2, %v80_v34 }
 0x120   :  { %v88_v37 = vpop.permute.xlu0 %87 }
 0x121   :  { %v84_v36 = vpop.permute.xlu1 %83 }
 0x122   :  { %v101_v38 = vsel %vm100_vm7, %v99_v35, %v84_v36 }
 0x123   :  { %v103_v40 = vsel %vm102_vm8, %v101_v38, %v88_v37 }
 0x125   :  { %v92_v39 = vpop.permute.xlu1 %91 }
 0x126   :  { %v105_v41 = vsel %vm104_vm9, %v103_v40, %v92_v39  ;;  %v96_v42 = vpop.permute.xlu0 %95 }
 0x127   :  { %v107_v43 = vsel %vm106_vm10, %v105_v41, %v96_v42 }
 0x128   :  { %v109_v44 = vsel %vm108_vm11, %v107_v43, 1.0 }
 0x129   :  { %272 = vmatmul.mubr.msk.f32.vlgmr.msra.gmra.mrb[0].mxu0 %vm118_vm12, %v109_v44 }
 0x1fc   :  { %v188_v45 = vpop.f32.mrb[0].mxu0 }
 0x1fd   :  { %v192_v46 = vmul.f32 %v188_v45, %v109_v44  ;;  %206 = vperm.xlu0 %310, %v188_v45   ;;  %v273_v47 = vpop.f32.mrb[1].mxu0 }
 0x1ff   :  { %v193_v48 = vsel %vm118_vm12, %v192_v46, 0.0 }
 0x200   :  { %194 = vadd.xlane.f32.xlu1 %v193_v48 }
 0x27c   :  { %v207_v56 = vpop.permute.xlu0 %206 }
 0x28d   :  { %v195_v52 = vpop.xlane.xlu1 %194 }
 0x28e   :  { %v200_v53 = vrot.slane %v195_v52, %v199_v50 }
 0x290   :  { %v203_v54 = vsel %vm202_vm13, %v200_v53, 0.0 }
 0x291   :  { %v212_v55 = vrot.slane %v203_v54, %v211_v51 }
 0x293   :  { %v213_v57 = vadd.f32 %v212_v55, %v207_v56 }
 0x295   :  { %v214_v58 = vand.u32 2147483647, %v213_v57  ;;  %vm220_vm14 = vcmp.ge.f32.partialorder %v213_v57, 0.0 }
 0x297   :  { %v215_v59 = vsub.f32 0.0, %v214_v58 }
 0x299   :  { %v216_v60 = vmul.f32 1.442695, %v215_v59 }
 0x29b   :  { %311 = vpow2.f32 %v216_v60 }
 0x2a5   :  { %v312_v61 = vpop.eup %311 }
 0x2a6   :  { %v218_v62 = vadd.f32 1.0, %v312_v61 }
 0x2a8   :  { %313 = vrcp.f32 %v218_v62 }
 0x2b2   :  { %v314_v63 = vpop.eup %313 }
 0x2b3   :  { %v221_v0 = vmul.f32 %v314_v63, %v312_v61 }
 0x2b5   :  { %v222_v1 = vsel %vm220_vm14, %v314_v63, %v221_v0 }
 0x2b6   :  { %223 = vst [vmem:[#allocation7] sm:$0xff] %v222_v1 }
 0x2b7   :  { %370 = shalt.err (!%p367_p6)
}
 0x2b8   :  { %s371_s15 = scalar_lea.hbm %s480_s2, 128 }
 0x2b9   :  { %p372_p7 = scmp.ne.s32.totalorder %s480_s2, %s371_s15  ;;  %p375_p8 = scmp.lt.u32.totalorder %s371_s15, %s480_s2 }
 0x2bb   :  { %p377_p9 = pnand %p375_p8, %p372_p7 }
 0x2bd   :  { %380 = shalt.err (!%p377_p9)
}
 0x2be   :  { %233 = dma.vmem_to_hbm [thread:$0]  %s231_s11, 128, %s480_s2, [#allocation4]  }
 0x2bf   :  { %385 = dma.done.wait [#allocation4], 128  }
 0x2c0   :  { %386 = vsyncadd [#allocation4], 4294967168 }
 0x2c1   :  { %237 = vsyncpa [#allocation3], 1 }
 0x2c2   :  { %238 = vsyncpa [#allocation6], 1 }
 0x2c3   :  { %239 = vsyncpa [#allocation4], 1 }

</bundles_post_ra>
